<compile_context>
chip_gen: v7x
topology: tpu7x:2x2x1
jax: 0.10.0
libtpu: 0.0.40
codegen_flags: <defaults>
</compile_context>

<pallas_src>
import numpy as np
import jax
import jax.numpy as jnp
from jax.experimental import pallas as pl
from jax.experimental.pallas import tpu as pltpu


def _round_up(x: int, m: int) -> int:
    return ((x + m - 1) // m) * m


def linear_kernel(x_ref, wt_ref, b_ref, o_ref, acc_ref):
    # grid = (M/tm, N/tn, K/tk); axis 2 (K) is the reduction axis.
    k = pl.program_id(2)

    @pl.when(k == 0)
    def _():
        acc_ref[...] = jnp.zeros_like(acc_ref)

    acc_ref[...] += jnp.dot(x_ref[...], wt_ref[...],
                            preferred_element_type=jnp.float32)

    @pl.when(k == pl.num_programs(2) - 1)
    def _():
        o_ref[...] = (acc_ref[...] + b_ref[...].astype(jnp.float32)).astype(o_ref.dtype)


def linear(x: jnp.ndarray, weight: jnp.ndarray, bias: jnp.ndarray | None = None,
           *, tm: int = 256, tn: int = 256, tk: int = 512) -> jnp.ndarray:
    """PyTorch F.linear: flatten x to 2-D, return x @ weight.T + bias."""
    if x.ndim != 2:
        x = x.reshape(x.shape[0], -1)
    M, K = x.shape
    N, K_w = weight.shape
    assert K == K_w, f"in_features mismatch: {K} vs {K_w}"

    out_dtype = x.dtype

    # Shrink tiles to the (padded) problem size when the problem is small.
    tm = min(tm, _round_up(M, 8))
    tn = min(tn, _round_up(N, 128))   # lane-dense output stores (>=128 lanes)
    tk = min(tk, _round_up(K, 128))
    Mp, Np, Kp = _round_up(M, tm), _round_up(N, tn), _round_up(K, tk)

    wt = weight.T                                       # (K, N): plain (tm,tk)@(tk,tn) in-kernel
    if bias is None:
        bias = jnp.zeros((N,), dtype=out_dtype)

    # Zero-pad to tile multiples (zeros contribute nothing to the matmul / bias add).
    xp = jnp.pad(x, ((0, Mp - M), (0, Kp - K))) if (Mp != M or Kp != K) else x
    wtp = jnp.pad(wt, ((0, Kp - K), (0, Np - N))) if (Kp != K or Np != N) else wt
    bp = jnp.pad(bias, (0, Np - N)) if Np != N else bias
    bp = bp.reshape(1, Np)

    grid = (Mp // tm, Np // tn, Kp // tk)

    out = pl.pallas_call(
        linear_kernel,
        out_shape=jax.ShapeDtypeStruct((Mp, Np), out_dtype),
        grid_spec=pltpu.PrefetchScalarGridSpec(
            num_scalar_prefetch=0,
            grid=grid,
            in_specs=[
                pl.BlockSpec((tm, tk), lambda i, j, k: (i, k)),   # x tile
                pl.BlockSpec((tk, tn), lambda i, j, k: (k, j)),   # weight.T tile
                pl.BlockSpec((1, tn), lambda i, j, k: (0, j)),    # bias tile
            ],
            out_specs=pl.BlockSpec((tm, tn), lambda i, j, k: (i, j)),
            scratch_shapes=[pltpu.VMEM((tm, tn), jnp.float32)],
        ),
        compiler_params=pltpu.CompilerParams(
            dimension_semantics=("parallel", "parallel", "arbitrary")),
    )(xp, wtp, bp)

    return out[:M, :N]


if __name__ == "__main__":
    key = jax.random.PRNGKey(0)
    k_x, k_w, k_b = jax.random.split(key, 3)

    # Module config: input_shape = (4, 16, 16) -> in_features = 1024, out_features = 32.
    batch, C, H, W = 2, 4, 16, 16
    in_features = C * H * W
    out_features = 32

    x = jax.random.normal(k_x, (batch, C, H, W), dtype=jnp.float32)

    # reset_parameters(): uniform(-stdv, stdv) with stdv = 1/sqrt(in_features)
    stdv = 1.0 / np.sqrt(in_features)
    weight = jax.random.uniform(k_w, (out_features, in_features),
                                dtype=jnp.float32, minval=-stdv, maxval=stdv)
    bias = jax.random.uniform(k_b, (out_features,),
                              dtype=jnp.float32, minval=-stdv, maxval=stdv)

    y = linear(x, weight, bias)
    y = jax.block_until_ready(y)

    assert y.shape == (batch, out_features), y.shape
    assert y.dtype == x.dtype

    # Reference in float64 numpy (module semantics: flatten, then x @ W.T + b).
    x_np = np.asarray(x, dtype=np.float64).reshape(batch, -1)
    y_ref = x_np @ np.asarray(weight, dtype=np.float64).T + np.asarray(bias, dtype=np.float64)
    np.testing.assert_allclose(np.asarray(y), y_ref, rtol=1e-3, atol=1e-3)

    print("KERNEL_OK")
</pallas_src>

<mosaic_0001>
module attributes {stable_mosaic.version = 11 : i64} {
  func.func @linear_kernel(%arg0: i32, %arg1: i32, %arg2: i32, %arg3: memref<8x512xf32, #tpu.memory_space<vmem>>, %arg4: memref<512x128xf32, #tpu.memory_space<vmem>>, %arg5: memref<1x128xf32, #tpu.memory_space<vmem>>, %arg6: memref<8x128xf32, #tpu.memory_space<vmem>>, %arg7: memref<8x128xf32, #tpu.memory_space<vmem>>) attributes {dimension_semantics = [#tpu.dimension_semantics<parallel>, #tpu.dimension_semantics<parallel>, #tpu.dimension_semantics<arbitrary>], iteration_bounds = array<i64: 1, 1, 2>, scalar_prefetch = 0 : i64, scratch_operands = 1 : i64, tpu.core_type = #tpu.core_type<tc>, window_params = [{transform_indices = @transform_0, window_bounds = array<i64: 8, 512>}, {transform_indices = @transform_1, window_bounds = array<i64: 512, 128>}, {transform_indices = @transform_2, window_bounds = array<i64: 1, 128>}, {transform_indices = @transform_3, window_bounds = array<i64: 8, 128>}]} {
    %c0_i32 = arith.constant 0 : i32
    %0 = arith.cmpi eq, %arg2, %c0_i32 : i32
    %1 = arith.extui %0 : i1 to i32
    %c0_i32_0 = arith.constant 0 : i32
    %2 = arith.cmpi ne, %1, %c0_i32_0 : i32
    scf.if %2 {
      %cst_9 = arith.constant 0.000000e+00 : f32
      %12 = vector.broadcast %cst_9 : f32 to vector<8x128xf32>
      %c0_10 = arith.constant 0 : index
      %c0_11 = arith.constant 0 : index
      %13 = vector.load %arg7[%c0_10, %c0_11] : memref<8x128xf32, #tpu.memory_space<vmem>>, vector<8x128xf32>
      tpu.vector_store %arg7[%c0_10, %c0_11], %12 {strides = array<i32>} : memref<8x128xf32, #tpu.memory_space<vmem>>, vector<8x128xf32>,
    } else {
    }
    %c0 = arith.constant 0 : index
    %c0_1 = arith.constant 0 : index
    %3 = vector.load %arg7[%c0, %c0_1] : memref<8x128xf32, #tpu.memory_space<vmem>>, vector<8x128xf32>
    %c0_2 = arith.constant 0 : index
    %c0_3 = arith.constant 0 : index
    %4 = vector.load %arg3[%c0_2, %c0_3] : memref<8x512xf32, #tpu.memory_space<vmem>>, vector<8x512xf32>
    %c0_4 = arith.constant 0 : index
    %c0_5 = arith.constant 0 : index
    %5 = vector.load %arg4[%c0_4, %c0_5] : memref<512x128xf32, #tpu.memory_space<vmem>>, vector<512x128xf32>
    %cst = arith.constant dense<0.000000e+00> : vector<8x128xf32>
    %6 = tpu.matmul %4, %5, %cst {dimension_numbers = #tpu.dot_dimension_numbers<[1], [0], [0], [1], [0, 0, 1, 1], [], []>} : vector<8x512xf32>, vector<512x128xf32>, vector<8x128xf32> -> vector<8x128xf32>
    %7 = arith.addf %3, %6 : vector<8x128xf32>
    %c0_6 = arith.constant 0 : index
    %c0_7 = arith.constant 0 : index
    %8 = vector.load %arg7[%c0_6, %c0_7] : memref<8x128xf32, #tpu.memory_space<vmem>>, vector<8x128xf32>
    tpu.vector_store %arg7[%c0_6, %c0_7], %7 {strides = array<i32>} : memref<8x128xf32, #tpu.memory_space<vmem>>, vector<8x128xf32>,
    %c1_i32 = arith.constant 1 : i32
    %9 = arith.cmpi eq, %arg2, %c1_i32 : i32
    %10 = arith.extui %9 : i1 to i32
    %c0_i32_8 = arith.constant 0 : i32
    %11 = arith.cmpi ne, %10, %c0_i32_8 : i32
    scf.if %11 {
      %c0_9 = arith.constant 0 : index
      %c0_10 = arith.constant 0 : index
      %12 = vector.load %arg7[%c0_9, %c0_10] : memref<8x128xf32, #tpu.memory_space<vmem>>, vector<8x128xf32>
      %c0_11 = arith.constant 0 : index
      %c0_12 = arith.constant 0 : index
      %13 = vector.load %arg5[%c0_11, %c0_12] : memref<1x128xf32, #tpu.memory_space<vmem>>, vector<1x128xf32>
      %14 = vector.broadcast %13 : vector<1x128xf32> to vector<8x128xf32>
      %15 = arith.addf %12, %14 : vector<8x128xf32>
      %c0_13 = arith.constant 0 : index
      %c0_14 = arith.constant 0 : index
      %16 = vector.load %arg6[%c0_13, %c0_14] : memref<8x128xf32, #tpu.memory_space<vmem>>, vector<8x128xf32>
      tpu.vector_store %arg6[%c0_13, %c0_14], %15 {strides = array<i32>} : memref<8x128xf32, #tpu.memory_space<vmem>>, vector<8x128xf32>,
    } else {
    }
    return
  }
  func.func @transform_0(%arg0: i32, %arg1: i32, %arg2: i32) -> (i32, i32) {
    %c0_i32 = arith.constant 0 : i32
    return %arg0, %arg2 : i32, i32
  }
  func.func @transform_1(%arg0: i32, %arg1: i32, %arg2: i32) -> (i32, i32) {
    %c0_i32 = arith.constant 0 : i32
    return %arg2, %arg1 : i32, i32
  }
  func.func @transform_2(%arg0: i32, %arg1: i32, %arg2: i32) -> (i32, i32) {
    %c0_i32 = arith.constant 0 : i32
    %c0_i32_0 = arith.constant 0 : i32
    return %c0_i32, %arg1 : i32, i32
  }
  func.func @transform_3(%arg0: i32, %arg1: i32, %arg2: i32) -> (i32, i32) {
    %c0_i32 = arith.constant 0 : i32
    return %arg0, %arg1 : i32, i32
  }
}

</mosaic_0001>

<bundles_post_ra>
// kernel: tpu_custom_call.1
= control target key start
LH: loop header
LB: loop body
LE: loop exit
PB: predicated region body
PF: predicated region fallthrough
CT: control target
= control target key end

     0   :  { %8 = vsyncpa [#allocation4], 0  ;;  %s1283_s0 = inlined_call_operand.hbm [shape: f32[8,1024], index: 0, kind: input, shape index: {}]   ;;  %s1284_s1 = inlined_call_operand.hbm [shape: f32[1024,128], index: 1, kind: input, shape index: {}]   ;;  %s1285_s2 = inlined_call_operand.vmem [shape: f32[1,128], index: 2, kind: input, shape index: {}]   ;;  %s1286_s3 = inlined_call_operand.hbm [shape: f32[8,128], index: 3, kind: output, shape index: {}]  }
   0x1   :  { %10 = vsyncpa [#allocation4 + $0x1], 0 }
   0x2   :  { %11 = vsyncpa [#allocation7], 0 }
   0x3   :  { %13 = vsyncpa [#allocation7 + $0x1], 0 }
   0x4   :  { %14 = vsyncpa [#allocation5], 0  ;;  %s1007_s12 = smov 0   ;;  %s1009_s13 = smov 0  }
   0x5   :  { %s1011_s14 = smov 0   ;;  %s1013_s15 = smov 0  }
   0x6   :  { %s1015_s16 = smov 0   ;;  %s1017_s17 = smov 0  }
   0x7 LB: > { %s609_s18 = sadd.s32 4294967295, %s979_s17   ;;  %s32_s19 = sadd.s32 1, %s975_s16  ;;  %s979_s17 = sphi %s1017_s17, %s20_s17   ;;  %s975_s16 = sphi %s1015_s16, %s1300_s16   ;;  %s971_s15 = sphi %s1013_s15, %s1299_s15   ;;  %s967_s14 = sphi %s1011_s14, %s1298_s14   ;;  %s963_s13 = sphi %s1009_s13, %s1297_s13   ;;  %s959_s12 = sphi %s1007_s12, %s1296_s12  }
   0x8   : > { %p33_p0 = scmp.ge.s32.totalorder %s32_s19, 2  ;;  %s48_s20 = sadd.s32 1, %s967_s14 }
   0x9   : > { %p55_p1 = scmp.ne.s32.totalorder %s967_s14, %s963_s13  ;;  %p56_p2 = scmp.eq.s32.totalorder %s979_s17, 0 }
   0xa   : > { %s1302_s19 = smov (%p33_p0, %s32_s19), 0  ;;  %p61_p4 = scmp.ne.s32.totalorder %s963_s13, %s959_s12 }
   0xb   : > { %p1043_p3 = por %p56_p2, %p55_p1  ;;  %s44_s22 = ssub.s32 %s975_s16, %s1302_s19 }
   0xc   : > { %p62_p5 = scmp.eq.s32.totalorder %s609_s18, 0  ;;  %p46_p6 = scmp.eq.s32.totalorder %s44_s22, 0 }
   0xd   : > { %p780_p8 = scmp.lt.s32.totalorder %s979_s17, 2  ;;  %s1061_s25 = sand.u32 1, %s967_s14  }
   0xe   : > { %p1052_p7 = por %p62_p5, %p61_p4  ;;  %s629_s26 = sshll.u32 %s975_s16, 9 }
   0xf   : > { %s1058_s24 = scalar_select %p46_p6, %s967_s14, %s48_s20  }
  0x10   : > { %s1289_s23 = scalar_select %p1052_p7, 1, 0 }
  0x11   : > { %s613_s27 = sshll.u32 %s1061_s25, 5  ;;  %s1068_s30 = scalar_lea.hbm %s1283_s0, %s629_s26 }
  0x12   : > { %s177_s4 = scalar_lea.vmem [#allocation3], %s613_s27  ;;  %p1072_p9 = pnand %p780_p8, %p1043_p3 }
  0x13   : > { %s187_s5 = sshll.u32 %s177_s4, 4  ;;  %s174_s7 = scalar_lea.sflag [#allocation4], %s1061_s25  ;;  %s1076_s5 = int_to_ptr.vmem [resolvable:$true] %s187_s5 }
  0x14   : > { %s835_s8 = scalar_lea.hbm %s1068_s30, 512  ;;  %p837_p13 = pneg %p1072_p9 }
  0x15   : > { %p836_p12 = scmp.ne.s32.totalorder %s1068_s30, %s835_s8  ;;  %s840_s11 = scalar_lea.hbm %s1283_s0, 1024 }
  0x16   : > { %p841_p2 = scmp.lt.u32.totalorder %s1068_s30, %s1283_s0  ;;  %p842_p3 = scmp.lt.u32.totalorder %s840_s11, %s835_s8 }
  0x17   : > { %p838_p0 = pnand %p837_p13, %p836_p12  ;;  %p844_p5 = scmp.lt.u32.totalorder %s835_s8, %s1068_s30 }
  0x18   : > { %p843_p4 = por %p842_p3, %p841_p2 }
  0x19   : > { %p839_p1 = pneg %p838_p0 }
  0x1a   : > { %p845_p6 = por %p844_p5, %p843_p4 }
  0x1c   : > { %p846_p8 = pnand %p845_p6, %p839_p1 }
  0x1e   : > { %849 = shalt.err (!%p846_p8)
}
  0x1f   : > { %s850_s21 = scalar_lea.vmem %s1076_s5, 512  ;;  %s981_s22 = smov [#allocation3]  }
  0x20   : > { %p851_p12 = scmp.ne.s32.totalorder %s1076_s5, %s850_s21  ;;  %s855_s26 = sshll.u32 %s981_s22, 4  ;;  %s856_s26 = int_to_ptr.vmem [resolvable:$false] %s855_s26 }
  0x21   : > { %s857_s27 = scalar_lea.vmem %s856_s26, 1024  ;;  %p858_p11 = scmp.lt.s32.totalorder %s1076_s5, %s856_s26 }
  0x22   : > { %p853_p0 = pnand %p851_p12, %p837_p13  ;;  %p859_p2 = scmp.lt.s32.totalorder %s857_s27, %s850_s21 }
  0x24   : > { %p854_p10 = pneg %p853_p0  ;;  %p860_p3 = por %p859_p2, %p858_p11 }
  0x26   : > { %p861_p4 = pnand %p860_p3, %p854_p10 }
  0x28   : > { %864 = shalt.err (!%p861_p4)
}
  0x29   : > { %776 = dma.hbm_to_vmem [thread:$0]  (!%p1072_p9), %s1068_s30, 512, %s1076_s5, %s174_s7  }
  0x2a   : > { %p1291_p1 = scmp.lt.s32.totalorder %s979_s17, 3  ;;  %p1292_p5 = scmp.ge.s32.totalorder %s979_s17, 1 }
  0x2b   : > { %s616_s29 = sshll.u32 %s1061_s25, 9  ;;  %s630_s4 = sshll.u32 %s975_s16, 13 }
  0x2c   : > { %p1110_p6 = pnand %p1292_p5, %p1291_p1  ;;  %s1119_s10 = scalar_lea.hbm %s1284_s1, %s630_s4 }
  0x2d   : > { %s198_s11 = scalar_lea.vmem [#allocation6], %s616_s29  ;;  %s195_s30 = scalar_lea.sflag [#allocation7], %s1061_s25 }
  0x2e   : > { %s206_s12 = sshll.u32 %s198_s11, 4  ;;  %s865_s5 = scalar_lea.hbm %s1119_s10, 8192  ;;  %s1121_s12 = int_to_ptr.vmem [resolvable:$true] %s206_s12 }
  0x2f   : > { %p866_p10 = scmp.ne.s32.totalorder %s1119_s10, %s865_s5  ;;  %s870_s21 = scalar_lea.hbm %s1284_s1, 16384 }
  0x30   : > { %p871_p12 = scmp.lt.u32.totalorder %s1119_s10, %s1284_s1  ;;  %p872_p0 = scmp.lt.u32.totalorder %s870_s21, %s865_s5 }
  0x31   : > { %p868_p11 = pnand %p866_p10, %p837_p13  ;;  %p874_p3 = scmp.lt.u32.totalorder %s865_s5, %s1119_s10 }
  0x32   : > { %p873_p2 = por %p872_p0, %p871_p12 }
  0x33   : > { %p869_p8 = pneg %p868_p11 }
  0x34   : > { %p875_p4 = por %p874_p3, %p873_p2 }
  0x36   : > { %p876_p1 = pnand %p875_p4, %p869_p8 }
  0x38   : > { %879 = shalt.err (!%p876_p1)
}
  0x39   : > { %s880_s27 = scalar_lea.vmem %s1121_s12, 8192  ;;  %s982_s29 = smov [#allocation6]  }
  0x3a   : > { %p881_p5 = scmp.ne.s32.totalorder %s1121_s12, %s880_s27  ;;  %s885_s4 = sshll.u32 %s982_s29, 4  ;;  %s886_s4 = int_to_ptr.vmem [resolvable:$false] %s885_s4 }
  0x3b   : > { %s887_s8 = scalar_lea.vmem %s886_s4, 16384  ;;  %p888_p7 = scmp.lt.s32.totalorder %s1121_s12, %s886_s4 }
  0x3c   : > { %p883_p10 = pnand %p881_p5, %p837_p13  ;;  %p889_p12 = scmp.lt.s32.totalorder %s887_s8, %s880_s27 }
  0x3e   : > { %p884_p11 = pneg %p883_p10  ;;  %p890_p0 = por %p889_p12, %p888_p7 }
  0x40   : > { %p891_p2 = pnand %p890_p0, %p884_p11 }
  0x42   : > { %894 = shalt.err (!%p891_p2)
}
  0x43   : > { %s983_s9 = smov 128   ;;  %s984_s11 = smov 8  }
  0x44   : > { %779 = dma.hbm_to_vmem [thread:$0]  (!%p1072_p9), %s1119_s10, 8192, %s1121_s12, %s195_s30, %s983_s9, %s983_s9, %s984_s11  }
  0x45   : > { %218 = sbr.rel (%p1110_p6) target bundleno = 381 (0x17d), region = 32  ;;  %s220_s5 = sand.u32 (!%p1110_p6), 1, %s963_s13  }
  0x46   : > { %s620_s7 = sshll.u32 (!%p1110_p6), %s220_s5, 5  ;;  %s221_s20 = scalar_lea.sflag (!%p1110_p6), [#allocation4], %s220_s5 }
  0x47   : > { %s1152_s21 = scalar_lea.vmem (!%p1110_p6), [#allocation3], %s620_s7  ;;  %p1294_p7 = scmp.ne.s32.totalorder (!%p1110_p6), %s1289_s23, 0 }
  0x4c   : > { %946 = dma.done.wait (%p1294_p7), %s221_s20, 512  }
  0x4d   : > { %948 = vsyncadd (%p1294_p7), %s221_s20, 4294966784  ;;  %s621_s22 = sshll.u32 %s220_s5, 9  ;;  %s230_s6 = scalar_lea.sflag [#allocation7], %s220_s5 }
  0x4e   : > { %s1158_s25 = scalar_lea.vmem [#allocation6], %s621_s22 }
  0x4f   : > { %950 = dma.done.wait (%p1294_p7), %s230_s6, 8192  }
  0x50   : > { %952 = vsyncadd (%p1294_p7), %s230_s6, 4294959104  ;;  %p622_p9 = scmp.ne.s32.totalorder %s971_s15, 0 }
  0x51   : > { %v985_v0 = vmov (!%p622_p9), 0.0  }
  0x52   : > { %267 = sbr.rel (%p622_p9) target bundleno = 89 (0x59), region = 44  ;;  %268 = vst [vmem:[#allocation2] sm:$0xff] (!%p622_p9), %v985_v0 }
  0x59 PF: > { %v290_v1 = vld [vmem:[%s1158_s25 + $0x80] sm:$0xff]  ;;  %v291_v2 = vld [vmem:[%s1158_s25 + $0x88] sm:$0xff]  ;;  %v292_v12 = vld [vmem:[%s1158_s25 + $0x90] sm:$0xff]  ;;  %p623_p13 = scmp.ne.s32.totalorder %s971_s15, 1 }
  0x5a   : > { %v322_v3 = vld [vmem:[%s1158_s25 + $0x180] sm:$0xff]  ;;  %v701_v4 = vpack.c.bf16 %v291_v2, %v290_v1  ;;  %v323_v5 = vld [vmem:[%s1158_s25 + $0x188] sm:$0xff]  ;;  %v293_v14 = vld [vmem:[%s1158_s25 + $0x98] sm:$0xff] }
  0x5b   : > { %v274_v6 = vld [vmem:[%s1158_s25] sm:$0xff]  ;;  %v275_v7 = vld [vmem:[%s1158_s25 + $0x8] sm:$0xff]  ;;  %v733_v8 = vpack.c.bf16 %v323_v5, %v322_v3  ;;  %v324_v15 = vld [vmem:[%s1158_s25 + $0x190] sm:$0xff]  ;;  %v705_v17 = vpack.c.bf16 %v293_v14, %v292_v12 }
  0x5c   : > { %v703_v9 = vpack.c.bf16 %v275_v7, %v274_v6  ;;  %v306_v10 = vld [vmem:[%s1158_s25 + $0x100] sm:$0xff]  ;;  %v307_v11 = vld [vmem:[%s1158_s25 + $0x108] sm:$0xff]  ;;  %702 = vmatprep.subr.bf16.mxu0 %v701_v4  ;;  %v325_v16 = vld [vmem:[%s1158_s25 + $0x198] sm:$0xff] }
  0x5d   : > { %v735_v13 = vpack.c.bf16 %v307_v11, %v306_v10  ;;  %734 = vmatprep.subr.bf16.mxu1 %v733_v8  ;;  %v737_v18 = vpack.c.bf16 %v325_v16, %v324_v15  ;;  %v276_v19 = vld [vmem:[%s1158_s25 + $0x10] sm:$0xff]  ;;  %v277_v20 = vld [vmem:[%s1158_s25 + $0x18] sm:$0xff]  ;;  %v294_v24 = vld [vmem:[%s1158_s25 + $0xa0] sm:$0xff] }
  0x5e   : > { %704 = vmatpush3.bf16.msra.mxu0 %v703_v9  ;;  %v308_v21 = vld [vmem:[%s1158_s25 + $0x110] sm:$0xff]  ;;  %v707_v22 = vpack.c.bf16 %v277_v20, %v276_v19  ;;  %v309_v23 = vld [vmem:[%s1158_s25 + $0x118] sm:$0xff]  ;;  %v295_v25 = vld [vmem:[%s1158_s25 + $0xa8] sm:$0xff] }
  0x5f   : > { %736 = vmatpush3.bf16.msra.mxu1 %v735_v13  ;;  %706 = vmatprep.subr.bf16.mxu0 %v705_v17  ;;  %v739_v26 = vpack.c.bf16 %v309_v23, %v308_v21  ;;  %v709_v27 = vpack.c.bf16 %v295_v25, %v294_v24  ;;  %v326_v28 = vld [vmem:[%s1158_s25 + $0x1a0] sm:$0xff]  ;;  %v327_v29 = vld [vmem:[%s1158_s25 + $0x1a8] sm:$0xff]  ;;  %v296_v36 = vld [vmem:[%s1158_s25 + $0xb0] sm:$0xff] }
  0x60   : > { %738 = vmatprep.subr.bf16.mxu1 %v737_v18  ;;  %v278_v30 = vld [vmem:[%s1158_s25 + $0x20] sm:$0xff]  ;;  %v741_v31 = vpack.c.bf16 %v327_v29, %v326_v28  ;;  %v279_v32 = vld [vmem:[%s1158_s25 + $0x28] sm:$0xff]  ;;  %v297_v37 = vld [vmem:[%s1158_s25 + $0xb8] sm:$0xff] }
  0x61   : > { %v310_v33 = vld [vmem:[%s1158_s25 + $0x120] sm:$0xff]  ;;  %v311_v34 = vld [vmem:[%s1158_s25 + $0x128] sm:$0xff]  ;;  %v711_v35 = vpack.c.bf16 %v279_v32, %v278_v30  ;;  %v328_v38 = vld [vmem:[%s1158_s25 + $0x1b0] sm:$0xff]  ;;  %v713_v40 = vpack.c.bf16 %v297_v37, %v296_v36 }
  0x62   : > { %708 = vmatpush3.bf16.msra.mxu0 %v707_v22  ;;  %v743_v39 = vpack.c.bf16 %v311_v34, %v310_v33  ;;  %v329_v41 = vld [vmem:[%s1158_s25 + $0x1b8] sm:$0xff]  ;;  %v280_v42 = vld [vmem:[%s1158_s25 + $0x30] sm:$0xff]  ;;  %v298_v47 = vld [vmem:[%s1158_s25 + $0xc0] sm:$0xff] }
  0x63   : > { %740 = vmatpush3.bf16.msra.mxu1 %v739_v26  ;;  %710 = vmatprep.subr.bf16.mxu0 %v709_v27  ;;  %v281_v43 = vld [vmem:[%s1158_s25 + $0x38] sm:$0xff]  ;;  %v745_v44 = vpack.c.bf16 %v329_v41, %v328_v38  ;;  %v312_v45 = vld [vmem:[%s1158_s25 + $0x130] sm:$0xff]  ;;  %v299_v48 = vld [vmem:[%s1158_s25 + $0xc8] sm:$0xff] }
  0x64   : > { %742 = vmatprep.subr.bf16.mxu1 %v741_v31  ;;  %v313_v46 = vld [vmem:[%s1158_s25 + $0x138] sm:$0xff]  ;;  %v330_v49 = vld [vmem:[%s1158_s25 + $0x1c0] sm:$0xff]  ;;  %v331_v50 = vld [vmem:[%s1158_s25 + $0x1c8] sm:$0xff]  ;;  %v715_v51 = vpack.c.bf16 %v281_v43, %v280_v42  ;;  %v717_v53 = vpack.c.bf16 %v299_v48, %v298_v47 }
  0x65   : > { %v747_v52 = vpack.c.bf16 %v313_v46, %v312_v45  ;;  %v282_v54 = vld [vmem:[%s1158_s25 + $0x40] sm:$0xff]  ;;  %v283_v55 = vld [vmem:[%s1158_s25 + $0x48] sm:$0xff]  ;;  %v749_v57 = vpack.c.bf16 %v331_v50, %v330_v49  ;;  %v300_v59 = vld [vmem:[%s1158_s25 + $0xd0] sm:$0xff] }
  0x66   : > { %712 = vmatpush3.bf16.msra.mxu0 %v711_v35  ;;  %v314_v56 = vld [vmem:[%s1158_s25 + $0x140] sm:$0xff]  ;;  %v315_v58 = vld [vmem:[%s1158_s25 + $0x148] sm:$0xff]  ;;  %v301_v60 = vld [vmem:[%s1158_s25 + $0xd8] sm:$0xff]  ;;  %v719_v63 = vpack.c.bf16 %v283_v55, %v282_v54 }
  0x67   : > { %744 = vmatpush3.bf16.msra.mxu1 %v743_v39  ;;  %714 = vmatprep.subr.bf16.mxu0 %v713_v40  ;;  %v332_v61 = vld [vmem:[%s1158_s25 + $0x1d0] sm:$0xff]  ;;  %v333_v62 = vld [vmem:[%s1158_s25 + $0x1d8] sm:$0xff]  ;;  %v751_v0 = vpack.c.bf16 %v315_v58, %v314_v56  ;;  %v721_v1 = vpack.c.bf16 %v301_v60, %v300_v59  ;;  %v302_v7 = vld [vmem:[%s1158_s25 + $0xe0] sm:$0xff] }
  0x68   : > { %746 = vmatprep.subr.bf16.mxu1 %v745_v44  ;;  %v284_v2 = vld [vmem:[%s1158_s25 + $0x50] sm:$0xff]  ;;  %v285_v3 = vld [vmem:[%s1158_s25 + $0x58] sm:$0xff]  ;;  %v753_v5 = vpack.c.bf16 %v333_v62, %v332_v61  ;;  %v303_v8 = vld [vmem:[%s1158_s25 + $0xe8] sm:$0xff] }
  0x69   : > { %v316_v4 = vld [vmem:[%s1158_s25 + $0x150] sm:$0xff]  ;;  %v317_v6 = vld [vmem:[%s1158_s25 + $0x158] sm:$0xff]  ;;  %v334_v9 = vld [vmem:[%s1158_s25 + $0x1e0] sm:$0xff]  ;;  %v723_v11 = vpack.c.bf16 %v285_v3, %v284_v2  ;;  %v725_v15 = vpack.c.bf16 %v303_v8, %v302_v7 }
  0x6a   : > { %716 = vmatpush3.bf16.msra.mxu0 %v715_v51  ;;  %v335_v10 = vld [vmem:[%s1158_s25 + $0x1e8] sm:$0xff]  ;;  %v286_v12 = vld [vmem:[%s1158_s25 + $0x60] sm:$0xff]  ;;  %v755_v14 = vpack.c.bf16 %v317_v6, %v316_v4  ;;  %v273_v18 = vld [vmem:[%s1152_s21 + $0x18] sm:$0xff] }
  0x6b   : > { %748 = vmatpush3.bf16.msra.mxu1 %v747_v52  ;;  %718 = vmatprep.subr.bf16.mxu0 %v717_v53  ;;  %v287_v13 = vld [vmem:[%s1158_s25 + $0x68] sm:$0xff]  ;;  %v318_v16 = vld [vmem:[%s1158_s25 + $0x160] sm:$0xff]  ;;  %v757_v19 = vpack.c.bf16 %v335_v10, %v334_v9  ;;  %v304_v21 = vld [vmem:[%s1158_s25 + $0xf0] sm:$0xff] }
  0x6c   : > { %750 = vmatprep.subr.bf16.mxu1 %v749_v57  ;;  %v271_v17 = vld [vmem:[%s1152_s21 + $0x8] sm:$0xff]  ;;  %v305_v22 = vld [vmem:[%s1158_s25 + $0xf8] sm:$0xff]  ;;  %v336_v23 = vld [vmem:[%s1158_s25 + $0x1f0] sm:$0xff]  ;;  %472 = vmatprep.mubr.f32.mxu1 %v273_v18  ;;  %v727_v25 = vpack.c.bf16 %v287_v13, %v286_v12 }
  0x6d   : > { %v319_v20 = vld [vmem:[%s1158_s25 + $0x168] sm:$0xff]  ;;  %402 = vmatprep.mubr.f32.mxu0 %v271_v17  ;;  %v337_v24 = vld [vmem:[%s1158_s25 + $0x1f8] sm:$0xff]  ;;  %v729_v27 = vpack.c.bf16 %v305_v22, %v304_v21  ;;  %v288_v28 = vld [vmem:[%s1158_s25 + $0x70] sm:$0xff] }
  0x6e   : > { %720 = vmatpush3.bf16.msra.mxu0 %v719_v63  ;;  %v759_v26 = vpack.c.bf16 %v319_v20, %v318_v16  ;;  %v289_v29 = vld [vmem:[%s1158_s25 + $0x78] sm:$0xff]  ;;  %v761_v30 = vpack.c.bf16 %v337_v24, %v336_v23  ;;  %v320_v31 = vld [vmem:[%s1158_s25 + $0x170] sm:$0xff]  ;;  %v270_v35 = vld [vmem:[%s1152_s21] sm:$0xff] }
  0x6f   : > { %752 = vmatpush3.bf16.msra.mxu1 %v751_v0  ;;  %722 = vmatprep.subr.bf16.mxu0 %v721_v1  ;;  %v321_v32 = vld [vmem:[%s1158_s25 + $0x178] sm:$0xff]  ;;  %v731_v33 = vpack.c.bf16 %v289_v29, %v288_v28  ;;  %v272_v36 = vld [vmem:[%s1152_s21 + $0x10] sm:$0xff] }
  0x70   : > { %754 = vmatprep.subr.bf16.mxu1 %v753_v5  ;;  %v763_v34 = vpack.c.bf16 %v321_v32, %v320_v31  ;;  %v269_v43 = vld [vmem:[#allocation2] sm:$0xff] }
  0x71   : > { %v624_v47 = vld [vmem:[%s1285_s2] ss:$0 sm:$0xff] (!%p623_p13) }
  0x72   : > { %724 = vmatpush3.bf16.msra.mxu0 %v723_v11 }
  0x73   : > { %756 = vmatpush3.bf16.msra.mxu1 %v755_v14  ;;  %726 = vmatprep.subr.bf16.mxu0 %v725_v15 }
  0x74   : > { %758 = vmatprep.subr.bf16.mxu1 %v757_v19 }
  0x76   : > { %728 = vmatpush3.bf16.msra.mxu0 %v727_v25 }
  0x77   : > { %760 = vmatpush3.bf16.msra.mxu1 %v759_v26  ;;  %730 = vmatprep.subr.bf16.mxu0 %v729_v27 }
  0x78   : > { %762 = vmatprep.subr.bf16.mxu1 %v761_v30 }
  0x7a   : > { %732 = vmatpush3.bf16.msra.mxu0 %v731_v33 }
  0x7b   : > { %764 = vmatpush3.bf16.msra.mxu1 %v763_v34 }
  0x7d   : > { %403 = vmatmul.mubr.f32.vlgmr.msra.gmra.mrb[0].mxu0 %v270_v35 }
  0x7e   : > { %473 = vmatmul.mubr.f32.vlgmr.msra.gmra.mrb[0].mxu1 %v272_v36 }
 0x150   : > { %v663_v37 = vpop.f32.mrb[0].mxu0 }
 0x151   : > { %v698_v38 = vpop.f32.mrb[0].mxu1  ;;  %v664_v39 = vpop.f32.mrb[1].mxu0 }
 0x152   : > { %v665_v40 = vadd.f32 %v664_v39, %v663_v37  ;;  %v699_v41 = vpop.f32.mrb[1].mxu1 }
 0x153   : > { %v700_v42 = vadd.f32 %v699_v41, %v698_v38  ;;  %483 = sbr.rel (%p623_p13) target bundleno = 356 (0x164), region = 48 }
 0x155   : > { %v475_v44 = vadd.f32 %v700_v42, %v665_v40 }
 0x157   : > { %v478_v45 = vadd.f32 %v475_v44, %v269_v43 }
 0x159   : > { %479 = vst [vmem:[#allocation2] sm:$0xff] %v478_v45 }
 0x160   : > { %v484_v46 = vld [vmem:[#allocation2] sm:$0xff] }
 0x161   : > { %v492_v48 = vadd.f32 %v624_v47, %v484_v46 }
 0x163   : > { %493 = vst [vmem:[#allocation8] sm:$0xff] %v492_v48 }
 0x164 PF: > { %p1239_p6 = scmp.eq.s32.totalorder %s609_s18, 1  ;;  %s986_s12 = smov [#allocation8]  }
 0x165   : > { %s504_s30 = sshll.u32 %s986_s12, 4  ;;  %s505_s30 = int_to_ptr.vmem [resolvable:$true] %s504_s30 }
 0x166   : > { %s895_s15 = scalar_lea.vmem %s505_s30, 128  ;;  %p902_p1 = scmp.lt.s32.totalorder %s505_s30, %s505_s30 }
 0x167   : > { %p896_p8 = scmp.ne.s32.totalorder %s505_s30, %s895_s15  ;;  %p903_p5 = scmp.lt.s32.totalorder %s895_s15, %s895_s15 }
 0x169   : > { %p897_p3 = pnand %p896_p8, %p1239_p6  ;;  %p904_p10 = por %p903_p5, %p902_p1 }
 0x16b   : > { %p898_p4 = pneg %p897_p3 }
 0x16d   : > { %p905_p11 = pnand %p904_p10, %p898_p4 }
 0x16f   : > { %908 = shalt.err (!%p905_p11)
}
 0x170   : > { %s909_s18 = scalar_lea.hbm %s1286_s3, 128 }
 0x171   : > { %p910_p12 = scmp.ne.s32.totalorder %s1286_s3, %s909_s18  ;;  %p915_p7 = scmp.lt.u32.totalorder %s909_s18, %s1286_s3 }
 0x173   : > { %p911_p0 = pnand %p910_p12, %p1239_p6 }
 0x175   : > { %p912_p2 = pneg %p911_p0 }
 0x177   : > { %p917_p9 = pnand %p915_p7, %p912_p2 }
 0x179   : > { %920 = shalt.err (!%p917_p9)
}
 0x17a   : > { %770 = dma.vmem_to_hbm [thread:$0]  (%p1239_p6), %s505_s30, 128, %s1286_s3, [#allocation5]  }
 0x17b   : > { %954 = dma.done.wait (%p1239_p6), [#allocation5], 128  }
 0x17c   : > { %956 = vsyncadd (%p1239_p6), [#allocation5], 4294967168 }
 0x17d PF: > { %s20_s17 = sadd.s32 1, %s979_s17   ;;  %s1296_s12 = smov %s963_s13 }
 0x17e   : > { %p17_p13 = scmp.ge.s32.totalorder %s20_s17, 4   ;;  %s1297_s13 = smov %s967_s14 }
 0x17f   : > { %s1298_s14 = smov %s1058_s24  ;;  %s1299_s15 = smov %s975_s16 }
 0x180   : > { %s1300_s16 = smov %s1302_s19  ;;  %19 = sbr.rel (!%p17_p13) target bundleno = 7 (0x7), region = 94 }
 0x187   :  { %517 = vsyncpa [#allocation4], 1 }
 0x188   :  { %519 = vsyncpa [#allocation4 + $0x1], 1 }
 0x189   :  { %520 = vsyncpa [#allocation7], 1 }
 0x18a   :  { %522 = vsyncpa [#allocation7 + $0x1], 1 }
 0x18b   :  { %523 = vsyncpa [#allocation5], 1 }
 0x18c   :  { %525 = vsyncpa [#allocation5 + $0x1], 1 }

</bundles_post_ra>
